<compile_context>
chip_gen: v5e
topology: v5e:2x2
jax: 0.10.0
libtpu: 0.0.40
codegen_flags: <defaults>
</compile_context>

<pallas_src>
import functools

import jax
import jax.numpy as jnp
from jax.experimental import pallas as pl
from jax.experimental.pallas import tpu as pltpu

_NEG_BIG = -1e30      # init value of the running max (finite "-inf")
_MASK_FILL = -1e38    # masked-logit fill; strictly below _NEG_BIG so that
                      # exp(_MASK_FILL - m) underflows to 0 even when a whole
                      # tile is masked (m still at _NEG_BIG). Degenerate C==1
                      # then yields -inf, matching torch.logsumexp over 0 cols.
_EPS_SQ = 1e-24       # (1e-12)^2 : matches torch F.normalize(..., eps=1e-12)


def _round_up(a, b):
    return (a + b - 1) // b * b


def _tpu_config():
    """Best-effort per-generation VMEM budget / batch-tile target.

    v7x: 64 MiB VMEM per TensorCore, 2 TCs/chip -> smaller scoped-VMEM budget,
         and make sure both cores get a B tile.
    v5e: 128 MiB VMEM, 1 TC, 4x128 MXU, ~0.82 TB/s HBM -> lower B-tile target.
    v6e (and default): 128 MiB VMEM, 1 TC, 2x256 MXU -> big tiles, high limit.
    """
    vmem_cap = None
    try:
        cap = int(getattr(pltpu.get_tpu_info(), "vmem_capacity_bytes", 0) or 0)
        vmem_cap = cap if cap > 0 else None
    except Exception:
        pass
    kind = ""
    try:
        kind = jax.devices()[0].device_kind.lower()
    except Exception:
        pass
    is_v7 = ("v7" in kind) or (vmem_cap is not None and vmem_cap <= 64 * 2**20)
    if is_v7:
        return {"vmem_limit": 48 * 2**20, "b_target": 512, "two_cores": True}
    if "v5" in kind:
        return {"vmem_limit": 100 * 2**20, "b_target": 256, "two_cores": False}
    return {"vmem_limit": 100 * 2**20, "b_target": 512, "two_cores": False}


def l2_normalize_rows_kernel(v_ref, o_ref):
    """Row-wise L2 normalize: v / max(||v||, 1e-12). Norms in f32, EUP rsqrt."""
    v = v_ref[...].astype(jnp.float32)
    ssq = jnp.sum(v * v, axis=1, keepdims=True)
    inv = jax.lax.rsqrt(jnp.maximum(ssq, _EPS_SQ))
    o_ref[...] = (v * inv).astype(o_ref.dtype)


def circle_loss_kernel(x_ref, w_ref, lab_ref, o_ref,
                       xn_sc, m_sc, s_sc, sp_sc,
                       *, margin, gamma, c_tile, num_classes, normalize_w):
    k = pl.program_id(1)
    num_k = pl.num_programs(1)

    # ---- per-B-tile init: normalize x once (x block is resident across k) ----
    @pl.when(k == 0)
    def _():
        x = x_ref[...].astype(jnp.float32)
        ssq = jnp.sum(x * x, axis=1, keepdims=True)
        inv = jax.lax.rsqrt(jnp.maximum(ssq, _EPS_SQ))
        xn_sc[...] = (x * inv).astype(xn_sc.dtype)
        m_sc[...] = jnp.full_like(m_sc, _NEG_BIG)
        s_sc[...] = jnp.zeros_like(s_sc)
        sp_sc[...] = jnp.zeros_like(sp_sc)

    # ---- weight block: pre-normalized by the pre-pass, or (small num_b)
    #      normalized here to skip the extra HBM round trip ----
    if normalize_w:
        w = w_ref[...].astype(jnp.float32)
        wssq = jnp.sum(w * w, axis=1, keepdims=True)
        winv = jax.lax.rsqrt(jnp.maximum(wssq, _EPS_SQ))
        wn = (w * winv).astype(xn_sc.dtype)
    else:
        wn = w_ref[...]

    # (B_TILE, C_TILE) similarity tile on the MXU; contraction expressed on the
    # last dims of both operands (no materialized weight transpose).
    sim = jax.lax.dot_general(
        xn_sc[...], wn,
        dimension_numbers=(((1,), (1,)), ((), ())),
        preferred_element_type=jnp.float32)

    b_tile, ct = sim.shape
    # Trace-constant local column index; per-step masking only needs a
    # (B_TILE,1) subtract and a scalar bound -- no global column tensor per k.
    local_col = jax.lax.broadcasted_iota(jnp.int32, (b_tile, ct), 1)
    is_pos = local_col == (lab_ref[...] - k * c_tile)
    is_valid_neg = jnp.logical_and(local_col < (num_classes - k * c_tile),
                                   jnp.logical_not(is_pos))

    # positive similarity: only the tile holding the label column contributes
    sp_sc[...] += jnp.sum(jnp.where(is_pos, sim, 0.0), axis=1, keepdims=True)

    # negative logits; label + padded class columns masked with _MASK_FILL
    an = jnp.maximum(sim + margin, 0.0)
    logit_n = jnp.where(is_valid_neg, an * (sim - margin) * gamma, _MASK_FILL)

    # online (streaming) logsumexp over the class axis
    m_prev = m_sc[...]
    m_new = jnp.maximum(m_prev, jnp.max(logit_n, axis=1, keepdims=True))
    s_sc[...] = (jnp.exp(m_prev - m_new) * s_sc[...]
                 + jnp.sum(jnp.exp(logit_n - m_new), axis=1, keepdims=True))
    m_sc[...] = m_new
    # TODO(synk): if profiling shows the single EUP is the binding unit (small D),
    # evaluate a bf16-exp variant -- needs accuracy validation under gamma=256.

    # ---- finalize on the last C tile ----
    @pl.when(k == num_k - 1)
    def _():
        sp = sp_sc[...]
        ap = jnp.maximum(-sp + 1.0 + margin, 0.0)
        logit_p = -ap * (sp - (1.0 - margin)) * gamma   # logsumexp over 1 col == itself
        lse_n = m_sc[...] + jnp.log(s_sc[...])
        o_ref[...] = (lse_n + logit_p).astype(o_ref.dtype)


def _prepass_rows(c_tile, d_pad, in_itemsize, out_itemsize):
    """Row block for the weight-normalize pre-pass.

    Mem-bound pass: ~512-wide blocks already hit the HBM roofline. Must divide
    C_TILE so it also divides C_pad; kept well under the default scoped VMEM.
    """
    cap = (24 * 2**20) // (2 * d_pad * (in_itemsize + out_itemsize))
    for r in (512, 256, 128, 64, 32, 16, 8):
        if r <= cap and c_tile % r == 0:
            return r
    return c_tile


def circle_loss(x, weight, label, *, margin=0.25, gamma=256.0,
                mxu_dtype=None, b_tile=None, c_tile=None,
                fuse_weight_norm=None, weight_buffers=2):
    """CircleLoss forward. x: (B, D), weight: (C, D), label: (B,) int -> (B,) f32.

    mxu_dtype: MXU operand dtype. jnp.bfloat16 is worthwhile on ALL generations
      (v5e included: its MXU runs bf16 at full rate and this kernel keeps every
      norm / logit / logsumexp accumulator in f32); it halves the dominant
      weight HBM stream. Validate accuracy under gamma=256 at real shapes
      before enabling (bf16 sim error is amplified by ~2*gamma*|sim|).
    """
    B, D = x.shape
    C, D2 = weight.shape
    assert D == D2
    mxu_dtype = jnp.dtype(x.dtype) if mxu_dtype is None else jnp.dtype(mxu_dtype)
    mxu_itemsize = mxu_dtype.itemsize
    x_itemsize = jnp.dtype(x.dtype).itemsize
    w_itemsize = jnp.dtype(weight.dtype).itemsize

    cfg = _tpu_config()
    vmem_limit = cfg["vmem_limit"]

    # D is the lane / MXU-contraction axis: zero-pad to a multiple of 128
    # (zero columns change neither the norms nor the dot products).
    D_pad = _round_up(D, 128)

    # ---- B tile: the only knob raising arithmetic intensity on the streamed
    # weight matrix (AI = 2*B_TILE/itemsize FLOP per weight byte).
    if b_tile is not None:
        B_TILE = int(b_tile)
    else:
        # Cap by x-side VMEM: double-buffered x block + normalized-x scratch.
        x_budget = vmem_limit // 4
        bt_cap = x_budget // (D_pad * (2 * x_itemsize + mxu_itemsize))
        bt_cap = max(8, bt_cap // 8 * 8)
        B_TILE = min(cfg["b_target"], _round_up(B, 8), bt_cap)
        # v7x: 2 TensorCores -- make sure the "parallel" B axis has >= 2 tiles.
        if cfg["two_cores"] and B <= B_TILE and B > 16:
            B_TILE = _round_up((B + 1) // 2, 8)
    B_pad = _round_up(B, B_TILE)
    num_b = B_pad // B_TILE

    # Fuse weight L2-normalization into the main kernel for small num_b (the
    # pre-pass adds a full C*D HBM write + re-read); use the pre-pass when the
    # weights are re-streamed >= 3 times (it also down-casts to mxu_dtype once).
    fused = (num_b <= 2) if fuse_weight_norm is None else bool(fuse_weight_norm)
    stream_dtype = jnp.dtype(weight.dtype) if fused else mxu_dtype
    stream_itemsize = stream_dtype.itemsize

    # ---- C tile: co-scaled with B_TILE / D so the multi-buffered weight block
    # stays under ~1/3 of the scoped-VMEM budget and the (B_TILE, C_TILE) f32
    # temporaries (sim / an / logit / exp / masks) stay a few MiB (no spill).
    if c_tile is not None:
        C_TILE = int(c_tile)
    else:
        n_buf = max(2, int(weight_buffers))
        per_row = n_buf * D_pad * stream_itemsize
        if fused:
            per_row += D_pad * (4 + mxu_itemsize)   # in-kernel f32 upcast + cast
        ct_w = (vmem_limit // 3) // max(1, per_row)
        temps_budget = min(12 * 2**20, vmem_limit // 4)
        ct_t = temps_budget // (B_TILE * 4 * 5)
        ct = min(2048, ct_w, ct_t, _round_up(C, 128))
        C_TILE = (ct // 128 * 128) if ct >= 128 else max(8, ct // 8 * 8)
    C_pad = _round_up(C, C_TILE)
    num_c = C_pad // C_TILE

    # ---- pad inputs ----
    xp = x if (B_pad, D_pad) == (B, D) else jnp.pad(x, ((0, B_pad - B), (0, D_pad - D)))
    wp = weight if (C_pad, D_pad) == (C, D) else jnp.pad(weight, ((0, C_pad - C), (0, D_pad - D)))
    lab = label.astype(jnp.int32).reshape(-1, 1)
    labp = lab if B_pad == B else jnp.pad(lab, ((0, B_pad - B), (0, 0)))

    # ---- optional pre-pass: normalize class-weight rows once, cast to mxu_dtype ----
    if fused:
        w_in = wp
    else:
        rows = _prepass_rows(C_TILE, D_pad, w_itemsize, mxu_itemsize)
        w_in = pl.pallas_call(
            l2_normalize_rows_kernel,
            out_shape=jax.ShapeDtypeStruct((C_pad, D_pad), mxu_dtype),
            grid_spec=pltpu.PrefetchScalarGridSpec(
                num_scalar_prefetch=0,
                grid=(C_pad // rows,),
                in_specs=[pl.BlockSpec((rows, D_pad), lambda i: (i, 0))],
                out_specs=pl.BlockSpec((rows, D_pad), lambda i: (i, 0))),
            compiler_params=pltpu.CompilerParams(
                dimension_semantics=("parallel",),
                vmem_limit_bytes=vmem_limit),
        )(wp)

    # ---- main kernel: grid (B tiles, C tiles); C is the streamed reduction ----
    w_spec_kwargs = {}
    if int(weight_buffers) > 2:
        # Deeper buffering of the weight stream (v7x sweep; only helps when the
        # profile shows exposed DMA gaps between k steps).
        w_spec_kwargs["pipeline_mode"] = pl.Buffered(int(weight_buffers))
    w_spec = pl.BlockSpec((C_TILE, D_pad), lambda i, k: (k, 0), **w_spec_kwargs)

    cost = pl.CostEstimate(
        flops=int(2 * B_pad * C_pad * D_pad),
        transcendentals=int(B_pad * C_pad),
        bytes_accessed=int(B_pad * D_pad * x_itemsize
                           + num_b * C_pad * D_pad * stream_itemsize
                           + B_pad * 4))

    out = pl.pallas_call(
        functools.partial(circle_loss_kernel, margin=float(margin),
                          gamma=float(gamma), c_tile=C_TILE, num_classes=C,
                          normalize_w=fused),
        out_shape=jax.ShapeDtypeStruct((B_pad, 1), jnp.float32),
        grid_spec=pltpu.PrefetchScalarGridSpec(
            num_scalar_prefetch=0,
            grid=(num_b, num_c),
            in_specs=[
                pl.BlockSpec((B_TILE, D_pad), lambda i, k: (i, 0)),  # x (resident over k)
                w_spec,                                              # weight stream
                pl.BlockSpec((B_TILE, 1), lambda i, k: (i, 0)),      # labels
            ],
            out_specs=pl.BlockSpec((B_TILE, 1), lambda i, k: (i, 0)),
            scratch_shapes=[
                pltpu.VMEM((B_TILE, D_pad), mxu_dtype),   # normalized x tile
                pltpu.VMEM((B_TILE, 1), jnp.float32),     # running max (logsumexp)
                pltpu.VMEM((B_TILE, 1), jnp.float32),     # running sum (logsumexp)
                pltpu.VMEM((B_TILE, 1), jnp.float32),     # sp (positive similarity)
            ]),
        compiler_params=pltpu.CompilerParams(
            dimension_semantics=("parallel", "arbitrary"),
            vmem_limit_bytes=vmem_limit),
        cost_estimate=cost,
    )(xp, w_in, labp)

    return out[:B, 0]


def circle_loss_ref(x, weight, label, *, margin=0.25, gamma=256.0):
    # Pure-JAX reference mirroring the PyTorch forward.
    eps = 1e-12
    xn = x / jnp.maximum(jnp.linalg.norm(x, axis=1, keepdims=True), eps)
    wn = weight / jnp.maximum(jnp.linalg.norm(weight, axis=1, keepdims=True), eps)
    sim = xn @ wn.T
    one_hot = jax.nn.one_hot(label, weight.shape[0], dtype=bool)
    sp = jnp.sum(jnp.where(one_hot, sim, 0.0), axis=1, keepdims=True)
    ap = jnp.maximum(-sp + 1.0 + margin, 0.0)
    an = jnp.maximum(sim + margin, 0.0)
    logit_p = -ap * (sp - (1.0 - margin)) * gamma
    logit_n = jnp.where(one_hot, -jnp.inf, an * (sim - margin) * gamma)
    return jax.scipy.special.logsumexp(logit_n, axis=1) + logit_p[:, 0]


if __name__ == "__main__":
    # Module hyper-params and small shapes.
    B = 8
    in_features = 32     # emdsize
    out_features = 16    # class_num
    margin = 0.25
    gamma = 256.0

    key = jax.random.PRNGKey(0)
    kx, kw, kl, kx2, kw2, kl2 = jax.random.split(key, 6)

    # xavier_uniform_ on weight of shape (class_num, emdsize).
    bound = float(jnp.sqrt(6.0 / (in_features + out_features)))
    weight = jax.random.uniform(kw, (out_features, in_features),
                                minval=-bound, maxval=bound, dtype=jnp.float32)
    x = jax.random.normal(kx, (B, in_features), dtype=jnp.float32)
    label = jax.random.randint(kl, (B,), 0, out_features, dtype=jnp.int32)

    # 1) Default tiling (single B tile -> fused in-kernel weight normalization).
    out = jax.block_until_ready(circle_loss(x, weight, label, margin=margin, gamma=gamma))
    ref = circle_loss_ref(x, weight, label, margin=margin, gamma=gamma)
    assert out.shape == (B,)
    assert jnp.allclose(out, ref, rtol=3e-4, atol=3e-3), (out, ref)

    # 2) Forced multi-tile grid (3 B tiles x 3 C tiles, padded class dim):
    #    exercises the online logsumexp / sp accumulation across C tiles and
    #    both the fused and the pre-pass weight-normalization paths.
    B2, C2 = 24, 40
    x2 = jax.random.normal(kx2, (B2, in_features), dtype=jnp.float32)
    w2 = jax.random.uniform(kw2, (C2, in_features),
                            minval=-bound, maxval=bound, dtype=jnp.float32)
    label2 = jax.random.randint(kl2, (B2,), 0, C2, dtype=jnp.int32)
    ref2 = circle_loss_ref(x2, w2, label2, margin=margin, gamma=gamma)
    for fuse in (None, True, False):   # None -> auto (num_b == 3 -> pre-pass)
        out2 = jax.block_until_ready(
            circle_loss(x2, w2, label2, margin=margin, gamma=gamma,
                        b_tile=8, c_tile=16, fuse_weight_norm=fuse))
        assert out2.shape == (B2,)
        assert jnp.allclose(out2, ref2, rtol=3e-4, atol=3e-3), (fuse, out2, ref2)

    # 3) bf16 MXU-operand path (worthwhile on v5e/v6e/v7x); f32 accumulators.
    #    Validate accuracy at realistic D before enabling in production
    #    (gamma=256 amplifies sim rounding error).
    out_bf16 = jax.block_until_ready(
        circle_loss(x, weight, label, margin=margin, gamma=gamma,
                    mxu_dtype=jnp.bfloat16))
    assert out_bf16.shape == (B,) and bool(jnp.all(jnp.isfinite(out_bf16)))

    print("KERNEL_OK")
</pallas_src>

<mosaic_0001>
module attributes {stable_mosaic.version = 11 : i64} {
  func.func @circle_loss_kernel(%arg0: i32, %arg1: i32, %arg2: memref<8x128xf32, #tpu.memory_space<vmem>>, %arg3: memref<128x128xf32, #tpu.memory_space<vmem>>, %arg4: memref<8x1xi32, #tpu.memory_space<vmem>>, %arg5: memref<8x1xf32, #tpu.memory_space<vmem>>, %arg6: memref<8x128xf32, #tpu.memory_space<vmem>>, %arg7: memref<8x1xf32, #tpu.memory_space<vmem>>, %arg8: memref<8x1xf32, #tpu.memory_space<vmem>>, %arg9: memref<8x1xf32, #tpu.memory_space<vmem>>) attributes {dimension_semantics = [#tpu.dimension_semantics<parallel>, #tpu.dimension_semantics<arbitrary>], iteration_bounds = array<i64: 1, 1>, scalar_prefetch = 0 : i64, scratch_operands = 4 : i64, tpu.core_type = #tpu.core_type<tc>, window_params = [{transform_indices = @transform_0, window_bounds = array<i64: 8, 128>}, {transform_indices = @transform_1, window_bounds = array<i64: 128, 128>}, {transform_indices = @transform_2, window_bounds = array<i64: 8, 1>}, {transform_indices = @transform_3, window_bounds = array<i64: 8, 1>}]} {
    %c0_i32 = arith.constant 0 : i32
    %0 = arith.cmpi eq, %arg1, %c0_i32 : i32
    %1 = arith.extui %0 : i1 to i32
    %c0_i32_0 = arith.constant 0 : i32
    %2 = arith.cmpi ne, %1, %c0_i32_0 : i32
    scf.if %2 {
      %c0_33 = arith.constant 0 : index
      %c0_34 = arith.constant 0 : index
      %64 = vector.load %arg2[%c0_33, %c0_34] : memref<8x128xf32, #tpu.memory_space<vmem>>, vector<8x128xf32>
      %65 = arith.mulf %64, %64 : vector<8x128xf32>
      %cst_35 = arith.constant dense<0.000000e+00> : vector<8xf32>
      %66 = vector.multi_reduction <add>, %65, %cst_35 [1] : vector<8x128xf32> to vector<8xf32>
      %67 = vector.shape_cast %66 : vector<8xf32> to vector<8x1xf32>
      %cst_36 = arith.constant 1.000000e-24 : f32
      %68 = vector.broadcast %cst_36 : f32 to vector<8x1xf32>
      %69 = arith.maximumf %67, %68 : vector<8x1xf32>
      %70 = math.rsqrt %69 : vector<8x1xf32>
      %71 = vector.broadcast %70 : vector<8x1xf32> to vector<8x128xf32>
      %72 = arith.mulf %64, %71 : vector<8x128xf32>
      %c0_37 = arith.constant 0 : index
      %c0_38 = arith.constant 0 : index
      %73 = vector.load %arg6[%c0_37, %c0_38] : memref<8x128xf32, #tpu.memory_space<vmem>>, vector<8x128xf32>
      tpu.vector_store %arg6[%c0_37, %c0_38], %72 {strides = array<i32>} : memref<8x128xf32, #tpu.memory_space<vmem>>, vector<8x128xf32>,
      %cst_39 = arith.constant -1.000000e+30 : f32
      %74 = vector.broadcast %cst_39 : f32 to vector<8x1xf32>
      %c0_40 = arith.constant 0 : index
      %c0_41 = arith.constant 0 : index
      %75 = vector.load %arg7[%c0_40, %c0_41] : memref<8x1xf32, #tpu.memory_space<vmem>>, vector<8x1xf32>
      tpu.vector_store %arg7[%c0_40, %c0_41], %74 {strides = array<i32>} : memref<8x1xf32, #tpu.memory_space<vmem>>, vector<8x1xf32>,
      %cst_42 = arith.constant 0.000000e+00 : f32
      %76 = vector.broadcast %cst_42 : f32 to vector<8x1xf32>
      %c0_43 = arith.constant 0 : index
      %c0_44 = arith.constant 0 : index
      %77 = vector.load %arg8[%c0_43, %c0_44] : memref<8x1xf32, #tpu.memory_space<vmem>>, vector<8x1xf32>
      tpu.vector_store %arg8[%c0_43, %c0_44], %76 {strides = array<i32>} : memref<8x1xf32, #tpu.memory_space<vmem>>, vector<8x1xf32>,
      %cst_45 = arith.constant 0.000000e+00 : f32
      %78 = vector.broadcast %cst_45 : f32 to vector<8x1xf32>
      %c0_46 = arith.constant 0 : index
      %c0_47 = arith.constant 0 : index
      %79 = vector.load %arg9[%c0_46, %c0_47] : memref<8x1xf32, #tpu.memory_space<vmem>>, vector<8x1xf32>
      tpu.vector_store %arg9[%c0_46, %c0_47], %78 {strides = array<i32>} : memref<8x1xf32, #tpu.memory_space<vmem>>, vector<8x1xf32>,
    } else {
    }
    %c0 = arith.constant 0 : index
    %c0_1 = arith.constant 0 : index
    %3 = vector.load %arg3[%c0, %c0_1] : memref<128x128xf32, #tpu.memory_space<vmem>>, vector<128x128xf32>
    %4 = arith.mulf %3, %3 : vector<128x128xf32>
    %cst = arith.constant dense<0.000000e+00> : vector<128xf32>
    %5 = vector.multi_reduction <add>, %4, %cst [1] : vector<128x128xf32> to vector<128xf32>
    %6 = vector.shape_cast %5 : vector<128xf32> to vector<128x1xf32>
    %cst_2 = arith.constant 1.000000e-24 : f32
    %7 = vector.broadcast %cst_2 : f32 to vector<128x1xf32>
    %8 = arith.maximumf %6, %7 : vector<128x1xf32>
    %9 = math.rsqrt %8 : vector<128x1xf32>
    %10 = vector.broadcast %9 : vector<128x1xf32> to vector<128x128xf32>
    %11 = arith.mulf %3, %10 : vector<128x128xf32>
    %c0_3 = arith.constant 0 : index
    %c0_4 = arith.constant 0 : index
    %12 = vector.load %arg6[%c0_3, %c0_4] : memref<8x128xf32, #tpu.memory_space<vmem>>, vector<8x128xf32>
    %cst_5 = arith.constant dense<0.000000e+00> : vector<8x128xf32>
    %13 = tpu.matmul %12, %11, %cst_5 {dimension_numbers = #tpu.dot_dimension_numbers<[1], [1], [0], [0], [0, 0, 1, 0], [], []>} : vector<8x128xf32>, vector<128x128xf32>, vector<8x128xf32> -> vector<8x128xf32>
    %14 = tpu.iota {dimensions = array<i32: 1>} : vector<8x128xi32>
    %c0_6 = arith.constant 0 : index
    %c0_7 = arith.constant 0 : index
    %15 = vector.load %arg4[%c0_6, %c0_7] : memref<8x1xi32, #tpu.memory_space<vmem>>, vector<8x1xi32>
    %c128_i32 = arith.constant 128 : i32
    %16 = arith.muli %arg1, %c128_i32 : i32
    %17 = vector.broadcast %16 : i32 to vector<8x1xi32>
    %18 = arith.subi %15, %17 : vector<8x1xi32>
    %19 = vector.broadcast %18 : vector<8x1xi32> to vector<8x128xi32>
    %20 = arith.cmpi eq, %14, %19 : vector<8x128xi32>
    %c128_i32_8 = arith.constant 128 : i32
    %21 = arith.muli %arg1, %c128_i32_8 : i32
    %c16_i32 = arith.constant 16 : i32
    %22 = arith.subi %c16_i32, %21 : i32
    %23 = vector.broadcast %22 : i32 to vector<8x128xi32>
    %24 = arith.cmpi slt, %14, %23 : vector<8x128xi32>
    %cst_9 = arith.constant dense<true> : vector<8x128xi1>
    %25 = arith.xori %20, %cst_9 : vector<8x128xi1>
    %26 = arith.andi %24, %25 : vector<8x128xi1>
    %c0_10 = arith.constant 0 : index
    %c0_11 = arith.constant 0 : index
    %27 = vector.load %arg9[%c0_10, %c0_11] : memref<8x1xf32, #tpu.memory_space<vmem>>, vector<8x1xf32>
    %cst_12 = arith.constant 0.000000e+00 : f32
    %28 = vector.broadcast %cst_12 : f32 to vector<8x128xf32>
    %29 = arith.select %20, %13, %28 : vector<8x128xi1>, vector<8x128xf32>
    %cst_13 = arith.constant dense<0.000000e+00> : vector<8xf32>
    %30 = vector.multi_reduction <add>, %29, %cst_13 [1] : vector<8x128xf32> to vector<8xf32>
    %31 = vector.shape_cast %30 : vector<8xf32> to vector<8x1xf32>
    %32 = arith.addf %27, %31 : vector<8x1xf32>
    %c0_14 = arith.constant 0 : index
    %c0_15 = arith.constant 0 : index
    %33 = vector.load %arg9[%c0_14, %c0_15] : memref<8x1xf32, #tpu.memory_space<vmem>>, vector<8x1xf32>
    tpu.vector_store %arg9[%c0_14, %c0_15], %32 {strides = array<i32>} : memref<8x1xf32, #tpu.memory_space<vmem>>, vector<8x1xf32>,
    %cst_16 = arith.constant 2.500000e-01 : f32
    %34 = vector.broadcast %cst_16 : f32 to vector<8x128xf32>
    %35 = arith.addf %13, %34 : vector<8x128xf32>
    %cst_17 = arith.constant 0.000000e+00 : f32
    %36 = vector.broadcast %cst_17 : f32 to vector<8x128xf32>
    %37 = arith.maximumf %35, %36 : vector<8x128xf32>
    %cst_18 = arith.constant 2.500000e-01 : f32
    %38 = vector.broadcast %cst_18 : f32 to vector<8x128xf32>
    %39 = arith.subf %13, %38 : vector<8x128xf32>
    %40 = arith.mulf %37, %39 : vector<8x128xf32>
    %cst_19 = arith.constant 2.560000e+02 : f32
    %41 = vector.broadcast %cst_19 : f32 to vector<8x128xf32>
    %42 = arith.mulf %40, %41 : vector<8x128xf32>
    %cst_20 = arith.constant -9.99999968E+37 : f32
    %43 = vector.broadcast %cst_20 : f32 to vector<8x128xf32>
    %44 = arith.select %26, %42, %43 : vector<8x128xi1>, vector<8x128xf32>
    %c0_21 = arith.constant 0 : index
    %c0_22 = arith.constant 0 : index
    %45 = vector.load %arg7[%c0_21, %c0_22] : memref<8x1xf32, #tpu.memory_space<vmem>>, vector<8x1xf32>
    %cst_23 = arith.constant dense<0xFF800000> : vector<8xf32>
    %46 = vector.multi_reduction <maximumf>, %44, %cst_23 [1] : vector<8x128xf32> to vector<8xf32>
    %47 = vector.shape_cast %46 : vector<8xf32> to vector<8x1xf32>
    %48 = arith.maximumf %45, %47 : vector<8x1xf32>
    %49 = arith.subf %45, %48 : vector<8x1xf32>
    %50 = math.exp %49 : vector<8x1xf32>
    %c0_24 = arith.constant 0 : index
    %c0_25 = arith.constant 0 : index
    %51 = vector.load %arg8[%c0_24, %c0_25] : memref<8x1xf32, #tpu.memory_space<vmem>>, vector<8x1xf32>
    %52 = arith.mulf %50, %51 : vector<8x1xf32>
    %53 = vector.broadcast %48 : vector<8x1xf32> to vector<8x128xf32>
    %54 = arith.subf %44, %53 : vector<8x128xf32>
    %55 = math.exp %54 : vector<8x128xf32>
    %cst_26 = arith.constant dense<0.000000e+00> : vector<8xf32>
    %56 = vector.multi_reduction <add>, %55, %cst_26 [1] : vector<8x128xf32> to vector<8xf32>
    %57 = vector.shape_cast %56 : vector<8xf32> to vector<8x1xf32>
    %58 = arith.addf %52, %57 : vector<8x1xf32>
    %c0_27 = arith.constant 0 : index
    %c0_28 = arith.constant 0 : index
    %59 = vector.load %arg8[%c0_27, %c0_28] : memref<8x1xf32, #tpu.memory_space<vmem>>, vector<8x1xf32>
    tpu.vector_store %arg8[%c0_27, %c0_28], %58 {strides = array<i32>} : memref<8x1xf32, #tpu.memory_space<vmem>>, vector<8x1xf32>,
    %c0_29 = arith.constant 0 : index
    %c0_30 = arith.constant 0 : index
    %60 = vector.load %arg7[%c0_29, %c0_30] : memref<8x1xf32, #tpu.memory_space<vmem>>, vector<8x1xf32>
    tpu.vector_store %arg7[%c0_29, %c0_30], %48 {strides = array<i32>} : memref<8x1xf32, #tpu.memory_space<vmem>>, vector<8x1xf32>,
    %c0_i32_31 = arith.constant 0 : i32
    %61 = arith.cmpi eq, %arg1, %c0_i32_31 : i32
    %62 = arith.extui %61 : i1 to i32
    %c0_i32_32 = arith.constant 0 : i32
    %63 = arith.cmpi ne, %62, %c0_i32_32 : i32
    scf.if %63 {
      %c0_33 = arith.constant 0 : index
      %c0_34 = arith.constant 0 : index
      %64 = vector.load %arg9[%c0_33, %c0_34] : memref<8x1xf32, #tpu.memory_space<vmem>>, vector<8x1xf32>
      %cst_35 = arith.constant 0.000000e+00 : f32
      %65 = vector.broadcast %cst_35 : f32 to vector<8x1xf32>
      %66 = arith.subf %65, %64 : vector<8x1xf32>
      %cst_36 = arith.constant 1.000000e+00 : f32
      %67 = vector.broadcast %cst_36 : f32 to vector<8x1xf32>
      %68 = arith.addf %66, %67 : vector<8x1xf32>
      %cst_37 = arith.constant 2.500000e-01 : f32
      %69 = vector.broadcast %cst_37 : f32 to vector<8x1xf32>
      %70 = arith.addf %68, %69 : vector<8x1xf32>
      %cst_38 = arith.constant 0.000000e+00 : f32
      %71 = vector.broadcast %cst_38 : f32 to vector<8x1xf32>
      %72 = arith.maximumf %70, %71 : vector<8x1xf32>
      %cst_39 = arith.constant 0.000000e+00 : f32
      %73 = vector.broadcast %cst_39 : f32 to vector<8x1xf32>
      %74 = arith.subf %73, %72 : vector<8x1xf32>
      %cst_40 = arith.constant 7.500000e-01 : f32
      %75 = vector.broadcast %cst_40 : f32 to vector<8x1xf32>
      %76 = arith.subf %64, %75 : vector<8x1xf32>
      %77 = arith.mulf %74, %76 : vector<8x1xf32>
      %cst_41 = arith.constant 2.560000e+02 : f32
      %78 = vector.broadcast %cst_41 : f32 to vector<8x1xf32>
      %79 = arith.mulf %77, %78 : vector<8x1xf32>
      %c0_42 = arith.constant 0 : index
      %c0_43 = arith.constant 0 : index
      %80 = vector.load %arg7[%c0_42, %c0_43] : memref<8x1xf32, #tpu.memory_space<vmem>>, vector<8x1xf32>
      %c0_44 = arith.constant 0 : index
      %c0_45 = arith.constant 0 : index
      %81 = vector.load %arg8[%c0_44, %c0_45] : memref<8x1xf32, #tpu.memory_space<vmem>>, vector<8x1xf32>
      %82 = math.log %81 : vector<8x1xf32>
      %83 = arith.addf %80, %82 : vector<8x1xf32>
      %84 = arith.addf %83, %79 : vector<8x1xf32>
      %c0_46 = arith.constant 0 : index
      %c0_47 = arith.constant 0 : index
      %85 = vector.load %arg5[%c0_46, %c0_47] : memref<8x1xf32, #tpu.memory_space<vmem>>, vector<8x1xf32>
      tpu.vector_store %arg5[%c0_46, %c0_47], %84 {strides = array<i32>} : memref<8x1xf32, #tpu.memory_space<vmem>>, vector<8x1xf32>,
    } else {
    }
    return
  }
  func.func @transform_0(%arg0: i32, %arg1: i32) -> (i32, i32) {
    %c0_i32 = arith.constant 0 : i32
    %c0_i32_0 = arith.constant 0 : i32
    return %arg0, %c0_i32 : i32, i32
  }
  func.func @transform_1(%arg0: i32, %arg1: i32) -> (i32, i32) {
    %c0_i32 = arith.constant 0 : i32
    %c0_i32_0 = arith.constant 0 : i32
    return %arg1, %c0_i32 : i32, i32
  }
  func.func @transform_2(%arg0: i32, %arg1: i32) -> (i32, i32) {
    %c0_i32 = arith.constant 0 : i32
    %c0_i32_0 = arith.constant 0 : i32
    return %arg0, %c0_i32 : i32, i32
  }
  func.func @transform_3(%arg0: i32, %arg1: i32) -> (i32, i32) {
    %c0_i32 = arith.constant 0 : i32
    %c0_i32_0 = arith.constant 0 : i32
    return %arg0, %c0_i32 : i32, i32
  }
}

</mosaic_0001>

<bundles_post_ra>
// kernel: tpu_custom_call.1
= control target key start
LH: loop header
LB: loop body
LE: loop exit
PB: predicated region body
PF: predicated region fallthrough
CT: control target
= control target key end

     0   :  { %8 = vsyncpa [#allocation7], 0  ;;  %s484_s15 = smov [#allocation6]   ;;  %s485_s17 = smov 128   ;;  %s836_s0 = inlined_call_operand.vmem [shape: f32[8,128], index: 0, kind: input, shape index: {}]   ;;  %s837_s1 = inlined_call_operand.hbm [shape: f32[128,128], index: 1, kind: input, shape index: {}]   ;;  %s838_s2 = inlined_call_operand.vmem [shape: s32[8,1], index: 2, kind: input, shape index: {}]   ;;  %s839_s3 = inlined_call_operand.vmem [shape: f32[8,1], index: 3, kind: output, shape index: {}]  }
   0x1   :  { %s15_s14 = sshll.u32 %s837_s1, 4  ;;  %s17_s16 = sshll.u32 %s484_s15, 4  ;;  %s16_s14 = int_to_ptr.hbm [resolvable:$true] %s15_s14  ;;  %s18_s16 = int_to_ptr.vmem [resolvable:$true] %s17_s16 }
   0x2   :  { %s486_s18 = smov 8  }
   0x3   :  { %23 = dma.hbm_to_vmem [thread:$0]  %s16_s14, 2048, %s18_s16, [#allocation7], %s485_s17, %s485_s17, %s486_s18  }
   0x4   :  { %482 = dma.done.wait [#allocation7], 2048  }
   0x5   :  { %483 = vsyncadd [#allocation7], 4294965248  ;;  %v514_v0 = vld [vmem:[#allocation6 + $0x78] sm:$0xff]  ;;  %v516_v1 = vld [vmem:[#allocation6 + $0x68] sm:$0xff] }
   0x6   :  { %v518_v2 = vld [vmem:[#allocation6 + $0x58] sm:$0xff]  ;;  %v86_v3 = vmul.f32 %v514_v0, %v514_v0  ;;  %v84_v4 = vmul.f32 %v516_v1, %v516_v1  ;;  %v526_v6 = vld [vmem:[#allocation6 + $0x70] sm:$0xff]  ;;  %v528_v7 = vld [vmem:[#allocation6 + $0x60] sm:$0xff] }
   0x7   :  { %v82_v5 = vmul.f32 %v518_v2, %v518_v2  ;;  %v530_v8 = vld [vmem:[#allocation6 + $0x50] sm:$0xff]  ;;  %v85_v9 = vmul.f32 %v526_v6, %v526_v6  ;;  %v83_v10 = vmul.f32 %v528_v7, %v528_v7  ;;  %v538_v12 = vld [vmem:[#allocation6 + $0x48] sm:$0xff]  ;;  %v540_v13 = vld [vmem:[#allocation6 + $0x40] sm:$0xff] }
   0x8   :  { %117 = vadd.xlane.f32.xlu0 %v86_v3  ;;  %113 = vadd.xlane.f32.xlu1 %v84_v4  ;;  %v81_v11 = vmul.f32 %v530_v8, %v530_v8  ;;  %v542_v14 = vld [vmem:[#allocation6 + $0x38] sm:$0xff]  ;;  %v80_v15 = vmul.f32 %v538_v12, %v538_v12  ;;  %v79_v16 = vmul.f32 %v540_v13, %v540_v13  ;;  %v550_v18 = vld [vmem:[#allocation6 + $0x30] sm:$0xff]  ;;  %v552_v19 = vld [vmem:[#allocation6 + $0x28] sm:$0xff] }
   0x9   :  { %109 = vadd.xlane.f32.xlu2 %v82_v5  ;;  %v78_v17 = vmul.f32 %v542_v14, %v542_v14  ;;  %v554_v20 = vld [vmem:[#allocation6 + $0x20] sm:$0xff]  ;;  %v77_v21 = vmul.f32 %v550_v18, %v550_v18  ;;  %v76_v22 = vmul.f32 %v552_v19, %v552_v19  ;;  %v562_v24 = vld [vmem:[#allocation6 + $0x18] sm:$0xff]  ;;  %v564_v25 = vld [vmem:[#allocation6 + $0x10] sm:$0xff] }
   0xa   :  { %v75_v23 = vmul.f32 %v554_v20, %v554_v20  ;;  %v566_v26 = vld [vmem:[#allocation6 + $0x8] sm:$0xff]  ;;  %v74_v27 = vmul.f32 %v562_v24, %v562_v24  ;;  %v73_v28 = vmul.f32 %v564_v25, %v564_v25  ;;  %v574_v30 = vld [vmem:[#allocation6] sm:$0xff] }
   0xb   :  { %v72_v29 = vmul.f32 %v566_v26, %v566_v26  ;;  %v579_v31 = vld [vmem:[%s836_s0] sm:$0xff]  ;;  %v71_v32 = vmul.f32 %v574_v30, %v574_v30 }
   0xc   :  { %v35_v33 = vmul.f32 %v579_v31, %v579_v31 }
  0x10   :  { %115 = vadd.xlane.f32.xlu0 %v85_v9  ;;  %111 = vadd.xlane.f32.xlu1 %v83_v10 }
  0x11   :  { %107 = vadd.xlane.f32.xlu2 %v81_v11 }
  0x18   :  { %105 = vadd.xlane.f32.xlu0 %v80_v15  ;;  %103 = vadd.xlane.f32.xlu1 %v79_v16 }
  0x19   :  { %101 = vadd.xlane.f32.xlu2 %v78_v17 }
  0x20   :  { %99 = vadd.xlane.f32.xlu0 %v77_v21  ;;  %97 = vadd.xlane.f32.xlu1 %v76_v22 }
  0x21   :  { %95 = vadd.xlane.f32.xlu2 %v75_v23 }
  0x28   :  { %93 = vadd.xlane.f32.xlu0 %v74_v27  ;;  %91 = vadd.xlane.f32.xlu1 %v73_v28 }
  0x29   :  { %89 = vadd.xlane.f32.xlu2 %v72_v29 }
  0x30   :  { %87 = vadd.xlane.f32.xlu0 %v71_v32  ;;  %36 = vadd.xlane.f32.xlu1 %v35_v33 }
  0x7b   :  { %v118_v34 = vpop.xlane.xlu0 %117  ;;  %v114_v35 = vpop.xlane.xlu1 %113 }
  0x7c   :  { %v134_v36 = vmax.f32 %v118_v34, 1e-24  ;;  %v585_v37 = vmax.f32 %v114_v35, 1e-24  ;;  %v110_v38 = vpop.xlane.xlu2 %109 }
  0x7d   :  { %v587_v39 = vmax.f32 %v110_v38, 1e-24 }
  0x7e   :  { %418 = vrsqrt.f32 %v134_v36  ;;  %vm291_vm1 = vweird.f32 %v134_v36  ;;  %vm271_vm3 = vweird.f32 %v585_v37 }
  0x7f   :  { %420 = vrsqrt.f32 %v585_v37  ;;  %vm251_vm11 = vweird.f32 %v587_v39 }
  0x80   :  { %422 = vrsqrt.f32 %v587_v39 }
  0x83   :  { %v116_v40 = vpop.xlane.xlu0 %115  ;;  %v112_v41 = vpop.xlane.xlu1 %111 }
  0x84   :  { %v419_v42 = vpop.eup %418  ;;  %v133_v43 = vmax.f32 %v116_v40, 1e-24  ;;  %v591_v44 = vmax.f32 %v112_v41, 1e-24  ;;  %v108_v45 = vpop.xlane.xlu2 %107 }
  0x85   :  { %v593_v46 = vpop.eup %420  ;;  %v286_v47 = vmul.f32 %v419_v42, %v134_v36  ;;  %v595_v48 = vmax.f32 %v108_v45, 1e-24  ;;  %vm292_vm0 = vweird.f32 %v419_v42 }
  0x86   :  { %v266_v49 = vmul.f32 %v593_v46, %v585_v37  ;;  %424 = vrsqrt.f32 %v133_v43  ;;  %v600_v51 = vpop.eup %422  ;;  %vm293_vm2 = vmor %vm291_vm1, %vm292_vm0  ;;  %vm281_vm5 = vweird.f32 %v133_v43  ;;  %vm272_vm6 = vweird.f32 %v593_v46 }
  0x87   :  { %v287_v50 = vmul.f32 %v419_v42, %v286_v47  ;;  %426 = vrsqrt.f32 %v591_v44  ;;  %v246_v54 = vmul.f32 %v600_v51, %v587_v39  ;;  %vm261_vm8 = vweird.f32 %v591_v44  ;;  %vm273_vm10 = vmor %vm271_vm3, %vm272_vm6 }
  0x88   :  { %428 = vrsqrt.f32 %v595_v48  ;;  %v267_v53 = vmul.f32 %v593_v46, %v266_v49  ;;  %vm252_vm12 = vweird.f32 %v600_v51  ;;  %vm241_vm15 = vweird.f32 %v595_v48 }
  0x89   :  { %v288_v52 = vmul.f32 0.5, %v287_v50  ;;  %v247_v11 = vmul.f32 %v600_v51, %v246_v54  ;;  %vm670_vm14 = vmor %vm251_vm11, %vm252_vm12 }
  0x8a   :  { %v268_v63 = vmul.f32 0.5, %v267_v53 }
  0x8b   :  { %v106_v55 = vpop.xlane.xlu0 %105  ;;  %v104_v56 = vpop.xlane.xlu1 %103  ;;  %v289_v57 = vsub.f32 1.5, %v288_v52  ;;  %v248_v29 = vmul.f32 0.5, %v247_v11 }
  0x8c   :  { %v425_v58 = vpop.eup %424  ;;  %v606_v59 = vmax.f32 %v106_v55, 1e-24  ;;  %v608_v60 = vmax.f32 %v104_v56, 1e-24  ;;  %v102_v61 = vpop.xlane.xlu2 %101  ;;  %v269_v22 = vsub.f32 1.5, %v268_v63 }
  0x8d   :  { %v610_v62 = vpop.eup %426  ;;  %v276_v3 = vmul.f32 %v425_v58, %v133_v43  ;;  %v290_v4 = vmul.f32 %v419_v42, %v289_v57  ;;  %v617_v10 = vmax.f32 %v102_v61, 1e-24  ;;  %vm282_vm4 = vweird.f32 %v425_v58 }
  0x8e   :  { %v612_v5 = vpop.eup %428  ;;  %v256_v9 = vmul.f32 %v610_v62, %v591_v44  ;;  %430 = vrsqrt.f32 %v606_v59  ;;  %v270_v45 = vmul.f32 %v593_v46, %v269_v22  ;;  %vm283_vm7 = vmor %vm281_vm5, %vm282_vm4  ;;  %v249_v47 = vsub.f32 1.5, %v248_v29 }
  0x8f   :  { %v277_v15 = vmul.f32 %v425_v58, %v276_v3  ;;  %432 = vrsqrt.f32 %v608_v60  ;;  %v236_v17 = vmul.f32 %v612_v5, %v595_v48  ;;  %v294_v21 = vsel %vm293_vm2, %v419_v42, %v290_v4 }
  0x90   :  { %v257_v16 = vmul.f32 %v610_v62, %v256_v9  ;;  %v310_v27 = vmul.f32 %v294_v21, %v514_v0  ;;  %434 = vrsqrt.f32 %v617_v10  ;;  %vm262_vm9 = vweird.f32 %v610_v62 }
  0x91   :  { %v278_v23 = vmul.f32 0.5, %v277_v15  ;;  %v237_v35 = vmul.f32 %v612_v5, %v236_v17  ;;  %v274_v57 = vsel %vm273_vm10, %v593_v46, %v270_v45  ;;  %vm263_vm13 = vmor %vm261_vm8, %vm262_vm9  ;;  %v250_v39 = vmul.f32 %v600_v51, %v249_v47 }
  0x92   :  { %v258_v28 = vmul.f32 0.5, %v257_v16  ;;  %312 = vmatpush.xpose.msra.mxu0 %v310_v27  ;;  %v308_v63 = vmul.f32 %v274_v57, %v516_v1  ;;  %vm242_vm0 = vweird.f32 %v612_v5  ;;  %vm231_vm2 = vweird.f32 %v606_v59 }
  0x93   :  { %v279_v32 = vsub.f32 1.5, %v278_v23  ;;  %v100_v33 = vpop.xlane.xlu0 %99  ;;  %v98_v41 = vpop.xlane.xlu1 %97  ;;  %v238_v55 = vmul.f32 0.5, %v237_v35  ;;  %v254_v21 = vsel %vm670_vm14, %v600_v51, %v250_v39  ;;  %vm691_vm1 = vmor %vm241_vm15, %vm242_vm0  ;;  %vm221_vm4 = vweird.f32 %v608_v60 }
  0x94   :  { %v627_v34 = vpop.eup %430  ;;  %v630_v36 = vmax.f32 %v100_v33, 1e-24  ;;  %v259_v38 = vsub.f32 1.5, %v258_v28  ;;  %v645_v52 = vmax.f32 %v98_v41, 1e-24  ;;  %v96_v54 = vpop.xlane.xlu2 %95  ;;  %v306_v29 = vmul.f32 %v254_v21, %v518_v2 }
  0x95   :  { %v633_v0 = vpop.eup %432  ;;  %v226_v40 = vmul.f32 %v627_v34, %v606_v59  ;;  %v280_v42 = vmul.f32 %v425_v58, %v279_v32  ;;  %v659_v61 = vmax.f32 %v96_v54, 1e-24  ;;  %v239_v46 = vsub.f32 1.5, %v238_v55 }
  0x96   :  { %v640_v49 = vpop.eup %434  ;;  %v216_v50 = vmul.f32 %v633_v0, %v608_v60  ;;  %436 = vrsqrt.f32 %v630_v36  ;;  %vm232_vm3 = vweird.f32 %v627_v34  ;;  %vm222_vm5 = vweird.f32 %v633_v0 }
  0x97   :  { %v284_v43 = vsel %vm283_vm7, %v425_v58, %v280_v42  ;;  %v227_v56 = vmul.f32 %v627_v34, %v226_v40  ;;  %v260_v58 = vmul.f32 %v610_v62, %v259_v38  ;;  %438 = vrsqrt.f32 %v645_v52  ;;  %vm233_vm6 = vmor %vm231_vm2, %vm232_vm3 }
  0x98   :  { %v309_v53 = vmul.f32 %v284_v43, %v526_v6  ;;  %v206_v6 = vmul.f32 %v640_v49, %v617_v10  ;;  %v217_v37 = vmul.f32 %v633_v0, %v216_v50  ;;  %440 = vrsqrt.f32 %v659_v61  ;;  %vm727_vm7 = vmor %vm221_vm4, %vm222_vm5 }
  0x99   :  { %v228_v3 = vmul.f32 0.5, %v227_v56  ;;  %v264_v9 = vsel %vm263_vm13, %v610_v62, %v260_v58  ;;  %v240_v23 = vmul.f32 %v612_v5, %v239_v46  ;;  %vm211_vm8 = vweird.f32 %v617_v10 }
  0x9a   :  { %313 = vmatpush.xpose.msra.mxu0 %v309_v53  ;;  %v207_v1 = vmul.f32 %v640_v49, %v206_v6  ;;  %v218_v44 = vmul.f32 0.5, %v217_v37  ;;  %v307_v62 = vmul.f32 %v264_v9, %v528_v7  ;;  %vm212_vm9 = vweird.f32 %v640_v49 }
  0x9b   :  { %v94_v4 = vpop.xlane.xlu0 %93  ;;  %v92_v17 = vpop.xlane.xlu1 %91  ;;  %v229_v22 = vsub.f32 1.5, %v228_v3  ;;  %v244_v41 = vsel %vm691_vm1, %v612_v5, %v240_v23  ;;  %vm746_vm10 = vmor %vm211_vm8, %vm212_vm9  ;;  %vm201_vm11 = vweird.f32 %v630_v36  ;;  %vm191_vm14 = vweird.f32 %v645_v52 }
  0x9c   :  { %v674_v15 = vpop.eup %436  ;;  %v680_v16 = vmax.f32 %v94_v4, 1e-24  ;;  %v696_v7 = vmax.f32 %v92_v17, 1e-24  ;;  %v219_v51 = vsub.f32 1.5, %v218_v44  ;;  %v208_v32 = vmul.f32 0.5, %v207_v1  ;;  %v90_v33 = vpop.xlane.xlu2 %89 }
  0x9d   :  { %v196_v48 = vmul.f32 %v674_v15, %v630_v36  ;;  %v689_v27 = vpop.eup %438  ;;  %v230_v2 = vmul.f32 %v627_v34, %v229_v22  ;;  %v712_v42 = vmax.f32 %v90_v33, 1e-24  ;;  %v305_v43 = vmul.f32 %v244_v41, %v530_v8 }
  0x9e   :  { %314 = vmatpush.xpose.msra.mxu0 %v308_v63  ;;  %442 = vrsqrt.f32 %v680_v16  ;;  %v701_v35 = vpop.eup %440  ;;  %v186_v40 = vmul.f32 %v689_v27, %v645_v52  ;;  %v209_v45 = vsub.f32 1.5, %v208_v32  ;;  %v220_v55 = vmul.f32 %v633_v0, %v219_v51  ;;  %v334_v52 = vld [vmem:[%s838_s2] sm:$0xff] }
  0x9f   :  { %v197_v38 = vmul.f32 %v674_v15, %v196_v48  ;;  %444 = vrsqrt.f32 %v696_v7  ;;  %v176_v47 = vmul.f32 %v701_v35, %v659_v61  ;;  %v234_v54 = vsel %vm233_vm6, %v627_v34, %v230_v2 }
  0xa0   :  { %v187_v50 = vmul.f32 %v689_v27, %v186_v40  ;;  %446 = vrsqrt.f32 %v712_v42  ;;  %v304_v34 = vmul.f32 %v234_v54, %v538_v12  ;;  %v210_v6 = vmul.f32 %v640_v49, %v209_v45 }
  0xa1   :  { %v198_v5 = vmul.f32 0.5, %v197_v38  ;;  %v177_v8 = vmul.f32 %v701_v35, %v176_v47  ;;  %v224_v39 = vsel %vm727_vm7, %v633_v0, %v220_v55  ;;  %vm202_vm12 = vweird.f32 %v674_v15 }
  0xa2   :  { %315 = vmatpush.xpose.msra.mxu0 %v307_v62  ;;  %v188_v63 = vmul.f32 0.5, %v187_v50  ;;  %v303_v9 = vmul.f32 %v224_v39, %v540_v13  ;;  %v214_v36 = vsel %vm746_vm10, %v640_v49, %v210_v6  ;;  %vm765_vm13 = vmor %vm201_vm11, %vm202_vm12  ;;  %vm192_vm15 = vweird.f32 %v689_v27 }
  0xa3   :  { %v88_v53 = vpop.xlane.xlu0 %87  ;;  %v37_v58 = vpop.xlane.xlu1 %36  ;;  %v199_v37 = vsub.f32 1.5, %v198_v5  ;;  %v178_v3 = vmul.f32 0.5, %v177_v8  ;;  %v302_v49 = vmul.f32 %v214_v36, %v542_v14  ;;  %vm785_vm0 = vmor %vm191_vm14, %vm192_vm15  ;;  %v487_v51 = vmov 0  }
  0xa4   :  { %v723_v56 = vpop.eup %442  ;;  %v735_v59 = vmax.f32 %v88_v53, 1e-24  ;;  %v751_v12 = vmax.f32 %v37_v58, 1e-24  ;;  %v189_v11 = vsub.f32 1.5, %v188_v63  ;;  %415 = vset.pattern.permute.xlu2 %v487_v51  ;;  %vm181_vm1 = vweird.f32 %v659_v61  ;;  %416 = vset.pattern.permute.xlu1 %v487_v51 }
  0xa5   :  { %v739_v60 = vpop.eup %444  ;;  %v166_v10 = vmul.f32 %v723_v56, %v680_v16  ;;  %v200_v44 = vmul.f32 %v674_v15, %v199_v37  ;;  %v179_v13 = vsub.f32 1.5, %v178_v3  ;;  %vm182_vm2 = vweird.f32 %v701_v35  ;;  %339 = vperm.xlu2 %415, %v334_v52   ;;  %417 = vset.pattern.permute.xlu0 %v487_v51 }
  0xa6   :  { %316 = vmatpush.xpose.msra.mxu0 %v306_v29  ;;  %v156_v4 = vmul.f32 %v739_v60, %v696_v7  ;;  %448 = vrsqrt.f32 %v735_v59  ;;  %v758_v0 = vpop.eup %446  ;;  %v190_v23 = vmul.f32 %v689_v27, %v189_v11  ;;  %vm183_vm3 = vmor %vm181_vm1, %vm182_vm2  ;;  %vm171_vm4 = vweird.f32 %v680_v16 }
  0xa7   :  { %v167_v1 = vmul.f32 %v723_v56, %v166_v10  ;;  %450 = vrsqrt.f32 %v751_v12  ;;  %v146_v21 = vmul.f32 %v758_v0, %v712_v42  ;;  %v204_v48 = vsel %vm765_vm13, %v674_v15, %v200_v44 }
  0xa8   :  { %v157_v17 = vmul.f32 %v739_v60, %v156_v4  ;;  %v301_v15 = vmul.f32 %v204_v48, %v550_v18  ;;  %v180_v32 = vmul.f32 %v701_v35, %v179_v13  ;;  %v194_v61 = vsel %vm785_vm0, %v689_v27, %v190_v23 }
  0xa9   :  { %v168_v22 = vmul.f32 0.5, %v167_v1  ;;  %v147_v14 = vmul.f32 %v758_v0, %v146_v21  ;;  %vm172_vm5 = vweird.f32 %v723_v56  ;;  %v300_v45 = vmul.f32 %v194_v61, %v552_v19 }
  0xaa   :  { %317 = vmatpush.xpose.msra.mxu0 %v305_v43  ;;  %v158_v40 = vmul.f32 0.5, %v157_v17  ;;  %v184_v5 = vsel %vm183_vm3, %v701_v35, %v180_v32  ;;  %vm173_vm6 = vmor %vm171_vm4, %vm172_vm5  ;;  %vm161_vm7 = vweird.f32 %v696_v7  ;;  %vm162_vm8 = vweird.f32 %v739_v60 }
  0xab   :  { %v169_v38 = vsub.f32 1.5, %v168_v22  ;;  %v148_v18 = vmul.f32 0.5, %v147_v14  ;;  %v299_v27 = vmul.f32 %v184_v5, %v554_v20  ;;  %vm163_vm9 = vmor %vm161_vm7, %vm162_vm8  ;;  %vm151_vm10 = vweird.f32 %v712_v42 }
  0xac   :  { %v783_v28 = vpop.eup %448  ;;  %v159_v47 = vsub.f32 1.5, %v158_v40  ;;  %vm152_vm11 = vweird.f32 %v758_v0  ;;  %vm141_vm13 = vweird.f32 %v735_v59  ;;  %vm45_vm15 = vweird.f32 %v751_v12 }
  0xad   :  { %v451_v33 = vpop.eup %450  ;;  %v136_v41 = vmul.f32 %v783_v28, %v735_v59  ;;  %v170_v50 = vmul.f32 %v723_v56, %v169_v38  ;;  %v149_v53 = vsub.f32 1.5, %v148_v18  ;;  %vm153_vm12 = vmor %vm151_vm10, %vm152_vm11  ;;  %vm142_vm14 = vweird.f32 %v783_v28 }
  0xae   :  { %318 = vmatpush.xpose.msra.mxu0 %v304_v34  ;;  %v40_v2 = vmul.f32 %v451_v33, %v751_v12  ;;  %v160_v55 = vmul.f32 %v739_v60, %v159_v47  ;;  %vm143_vm0 = vmor %vm141_vm13, %vm142_vm14  ;;  %vm46_vm1 = vweird.f32 %v451_v33  ;;  %vm51_vm3 = vcmask 7168  }
  0xaf   :  { %v137_v43 = vmul.f32 %v783_v28, %v136_v41  ;;  %v174_v19 = vsel %vm173_vm6, %v723_v56, %v170_v50  ;;  %v150_v20 = vmul.f32 %v758_v0, %v149_v53  ;;  %vm47_vm2 = vmor %vm45_vm15, %vm46_vm1  ;;  %v488_v63 = vmov -1e+30  }
  0xb0   :  { %v41_v16 = vmul.f32 %v451_v33, %v40_v2  ;;  %v298_v7 = vmul.f32 %v174_v19, %v562_v24  ;;  %v164_v8 = vsel %vm163_vm9, %v739_v60, %v160_v55  ;;  %52 = vst.msk [vmem:[#allocation3] sm:$0xff] %vm51_vm3, %v488_v63  ;;  %v332_v10 = vlaneseq }
  0xb1   :  { %v138_v54 = vmul.f32 0.5, %v137_v43  ;;  %v297_v34 = vmul.f32 %v164_v8, %v564_v25  ;;  %v154_v42 = vsel %vm153_vm12, %v758_v0, %v150_v20  ;;  %vm489_vm5 = vmmov 1  }
  0xb2   :  { %319 = vmatpush.xpose.msra.mxu0 %v303_v9  ;;  %v42_v35 = vmul.f32 0.5, %v41_v16  ;;  %v296_v24 = vmul.f32 %v154_v42, %v566_v26  ;;  %v333_v39 = vand.u32 127, %v332_v10  ;;  %v490_v11 = vmov 0.0  }
  0xb3   :  { %v139_v57 = vsub.f32 1.5, %v138_v54  ;;  %54 = vst.msk [vmem:[#allocation5] sm:$0xff] %vm51_vm3, %v490_v11 }
  0xb4   :  { %v43_v56 = vsub.f32 1.5, %v42_v35  ;;  %vm344_vm7 = vcmp.lt.s32.totalorder %v333_v39, 16  ;;  %53 = vst.msk [vmem:[#allocation4] sm:$0xff] %vm51_vm3, %v490_v11 }
  0xb5   :  { %v140_v58 = vmul.f32 %v783_v28, %v139_v57 }
  0xb6   :  { %320 = vmatpush.xpose.msra.mxu0 %v302_v49  ;;  %v44_v6 = vmul.f32 %v451_v33, %v43_v56 }
  0xb7   :  { %v144_v60 = vsel %vm143_vm0, %v783_v28, %v140_v58  ;;  %v360_v1 = vld [vmem:[#allocation3] sm:$0xff] }
  0xb8   :  { %v295_v59 = vmul.f32 %v144_v60, %v574_v30  ;;  %v48_v37 = vsel %vm47_vm2, %v451_v33, %v44_v6 }
  0xb9   :  { %v49_v25 = vmul.f32 %v48_v37, %v579_v31 }
  0xba   :  { %321 = vmatpush.xpose.msra.mxu0 %v301_v15  ;;  %v347_v13 = vld [vmem:[#allocation5] sm:$0xff] }
  0xbb   :  { %v367_v14 = vld [vmem:[#allocation4] sm:$0xff] }
  0xbe   :  { %322 = vmatpush.xpose.msra.mxu0 %v300_v45 }
  0xc2   :  { %323 = vmatpush.xpose.msra.mxu0 %v299_v27 }
  0xc6   :  { %324 = vmatpush.xpose.msra.mxu0 %v298_v7 }
  0xca   :  { %325 = vmatpush.xpose.msra.mxu0 %v297_v34 }
  0xce   :  { %326 = vmatpush.xpose.msra.mxu0 %v296_v24 }
  0xd2   :  { %327 = vmatpush.xpose.msra.mxu0 %v295_v59 }
  0xd5   :  { %328 = vmatmul.f32.vlgmr.msra.gmra.mxu0 %v49_v25 }
  0xff   :  { %v340_v46 = vpop.permute.xlu2 %339 }
 0x100   :  { %vm341_vm4 = vcmp.eq.s32.totalorder %v333_v39, %v340_v46 }
 0x101   :  { %vm345_vm6 = vmxor %vm341_vm4, %vm489_vm5 }
 0x102   :  { %vm346_vm8 = vmand %vm344_vm7, %vm345_vm6 }
 0x152   :  { %v329_v26 = vpop.f32.mrf.mxu0 }
 0x153   :  { %v354_v12 = vadd.f32 0.25, %v329_v26  ;;  %v406_v4 = vadd.f32 -0.25, %v329_v26  ;;  %v348_v0 = vsel %vm341_vm4, %v329_v26, 0.0 }
 0x155   :  { %v355_v3 = vmax.f32 %v354_v12, 0.0 }
 0x157   :  { %v357_v30 = vmul.f32 %v406_v4, %v355_v3 }
 0x159   :  { %v358_v9 = vmul.f32 256.0, %v357_v30 }
 0x15b   :  { %v359_v31 = vsel %vm346_vm8, %v358_v9, -1e+38 }
 0x15c   :  { %361 = vmax.xlane.f32.xlu0 %v359_v31 }
 0x164   :  { %349 = vadd.xlane.f32.xlu0 %v348_v0 }
 0x1cf   :  { %v362_v36 = vpop.xlane.xlu0 %361 }
 0x1d0   :  { %v363_v44 = vmax.f32 %v360_v1, %v362_v36 }
 0x1d2   :  { %v364_v62 = vsub.f32 %v360_v1, %v363_v44  ;;  %381 = vst.msk [vmem:[#allocation3] sm:$0xff] %vm51_vm3, %v363_v44  ;;  %371 = vperm.xlu1 %416, %v363_v44  }
 0x1d4   :  { %v365_v52 = vmul.f32 1.442695, %v364_v62 }
 0x1d7   :  { %v350_v17 = vpop.xlane.xlu0 %349 }
 0x1d8   :  { %v351_v21 = vadd.f32 %v350_v17, %v347_v13 }
 0x1d9   :  { %v394_v5 = vld [vmem:[#allocation3] sm:$0xff] }
 0x1da   :  { %353 = vst.msk [vmem:[#allocation5] sm:$0xff] %vm51_vm3, %v351_v21 }
 0x1e1   :  { %v385_v28 = vld [vmem:[#allocation5] sm:$0xff] }
 0x1e2   :  { %v386_v51 = vsub.f32 0.0, %v385_v28  ;;  %v407_v2 = vadd.f32 -0.75, %v385_v28 }
 0x1e4   :  { %v387_v32 = vadd.f32 1.0, %v386_v51 }
 0x1e6   :  { %v388_v40 = vadd.f32 0.25, %v387_v32 }
 0x1e8   :  { %v389_v41 = vmax.f32 %v388_v40, 0.0 }
 0x1ea   :  { %v390_v18 = vsub.f32 0.0, %v389_v41 }
 0x1ec   :  { %v392_v45 = vmul.f32 %v407_v2, %v390_v18 }
 0x1ee   :  { %v393_v50 = vmul.f32 256.0, %v392_v45 }
 0x244   :  { %v372_v49 = vpop.permute.xlu1 %371 }
 0x245   :  { %v374_v22 = vsub.f32 %v359_v31, %v372_v49 }
 0x247   :  { %v375_v48 = vmul.f32 1.442695, %v374_v22 }
 0x249   :  { %452 = vpow2.f32 %v375_v48 }
 0x24a   :  { %454 = vpow2.f32 %v365_v52 }
 0x24f   :  { %v453_v23 = vpop.eup %452 }
 0x250   :  { %377 = vadd.xlane.f32.xlu0 %v453_v23  ;;  %v455_v29 = vpop.eup %454 }
 0x251   :  { %v368_v15 = vmul.f32 %v455_v29, %v367_v14 }
 0x2c3   :  { %v378_v33 = vpop.xlane.xlu0 %377 }
 0x2c4   :  { %v379_v38 = vadd.f32 %v378_v33, %v368_v15 }
 0x2c6   :  { %380 = vst.msk [vmem:[#allocation4] sm:$0xff] %vm51_vm3, %v379_v38 }
 0x2cd   :  { %v395_v61 = vld [vmem:[#allocation4] sm:$0xff] }
 0x2ce   :  { %456 = vlog2.f32 %v395_v61 }
 0x2d4   :  { %v457_v47 = vpop.eup %456 }
 0x2d5   :  { %v397_v43 = vmul.f32 0.6931472, %v457_v47 }
 0x2d7   :  { %v398_v16 = vadd.f32 %v397_v43, %v394_v5 }
 0x2d9   :  { %v399_v27 = vadd.f32 %v398_v16, %v393_v50 }
 0x2db   :  { %400 = vst.msk [vmem:[%s839_s3] sm:$0xff] %vm51_vm3, %v399_v27 }
 0x2dc   :  { %405 = vsyncpa [#allocation7], 1 }

</bundles_post_ra>
